<compile_context>
chip_gen: v7x
topology: tpu7x:2x2x1
jax: 0.10.0
libtpu: 0.0.40
codegen_flags: <defaults>
</compile_context>

<pallas_src>
import functools

import jax
import jax.numpy as jnp
from jax.experimental import pallas as pl
from jax.experimental.pallas import tpu as pltpu

_BN_EPS = 1e-5


# --------------------------------------------------------------------------
# Tiling / padding helpers
# --------------------------------------------------------------------------
def _round_up(x, m):
    return (x + m - 1) // m * m


def _pick_n_tiling(n, h_resident):
    """Node-dim padding and (row tm, contraction tk) tiles for A_hat @ H."""
    if not h_resident:
        # H streamed per k-step: use big row tiles to amortize the restream.
        return _round_up(n, 512), 512, 512
    n_pad = _round_up(n, 128)
    if n_pad <= 256:
        return n_pad, n_pad, n_pad
    return _round_up(n, 256), 256, 256


def _pick_divisor_tile(dim, prefer=(512, 256, 128)):
    for t in prefer:
        if dim % t == 0:
            return t
    return dim


def _vmem_capacity_bytes():
    try:
        cap = getattr(pltpu.get_tpu_info(), "vmem_capacity_bytes", None)
        if cap:
            return int(cap)
    except Exception:
        pass
    return 64 << 20   # conservative default (v7x per-TensorCore VMEM)


def _compiler_params(dims, vmem_bytes=None):
    kwargs = dict(dimension_semantics=dims)
    if vmem_bytes is not None:
        kwargs["vmem_limit_bytes"] = int(vmem_bytes)
    return pltpu.CompilerParams(**kwargs)


# --------------------------------------------------------------------------
# Kernels
# --------------------------------------------------------------------------
def _xw_kernel(x_ref, w_ref, h_ref, acc_ref):
    """Tiled H = X @ W (bf16 operands, f32 accumulation, bf16 output)."""
    k = pl.program_id(1)
    nk = pl.num_programs(1)

    @pl.when(k == 0)
    def _():
        acc_ref[...] = jnp.zeros_like(acc_ref)

    acc_ref[...] += jnp.dot(x_ref[...], w_ref[...],
                            preferred_element_type=jnp.float32)

    @pl.when(k == nk - 1)
    def _():
        h_ref[...] = acc_ref[...].astype(h_ref.dtype)


def _bnrelu_xw_kernel(m_ref, scale_ref, shift_ref, w_ref, h_ref, acc_ref):
    """H = relu(M*scale + shift) @ W  -- previous layer's BN+ReLU fused in.

    The elementwise epilogue rides on VPU slots under the MXU matmul, so the
    interior layers never round-trip the activated tensor through HBM.
    """
    k = pl.program_id(1)
    nk = pl.num_programs(1)

    @pl.when(k == 0)
    def _():
        acc_ref[...] = jnp.zeros_like(acc_ref)

    x = jnp.maximum(m_ref[...].astype(jnp.float32) * scale_ref[...]
                    + shift_ref[...], 0.0).astype(jnp.bfloat16)
    acc_ref[...] += jnp.dot(x, w_ref[...], preferred_element_type=jnp.float32)

    @pl.when(k == nk - 1)
    def _():
        h_ref[...] = acc_ref[...].astype(h_ref.dtype)


def _adj_matmul_stats_kernel(a_ref, h_ref, m_ref, sum_ref, sq_ref, acc_ref,
                             *, n_valid, tm, tk, h_resident):
    """Tiled M = A_hat @ H plus masked per-row-tile BN partial statistics."""
    # NOTE: all grid queries are at the top level of the kernel body --
    # pl.program_id inside a pl.when body does not lower in interpret mode.
    i = pl.program_id(0)
    k = pl.program_id(1)
    nk = pl.num_programs(1)

    # Row-validity mask so BatchNorm statistics stay exact over the N nodes.
    row = i * tm + jax.lax.broadcasted_iota(jnp.int32, (tm, 1), 0)
    valid = (row < n_valid).astype(jnp.float32)

    @pl.when(k == 0)
    def _():
        acc_ref[...] = jnp.zeros_like(acc_ref)

    if h_resident:
        # H is fully VMEM-resident; slice this k-strip in place (no restream).
        h = h_ref[pl.ds(k * tk, tk), :]
    else:
        h = h_ref[...]
    acc_ref[...] += jnp.dot(a_ref[...], h, preferred_element_type=jnp.float32)

    @pl.when(k == nk - 1)
    def _():
        m = acc_ref[...]
        m_ref[...] = m.astype(m_ref.dtype)        # bf16 HBM write
        mv = m * valid                            # stats stay f32
        s = jnp.sum(mv, axis=0, keepdims=True)
        sq = jnp.sum(mv * mv, axis=0, keepdims=True)
        # Broadcast over 8 sublanes to keep an (8,128)-friendly output block;
        # host side divides the reduction by 8 (exact in f32).
        sum_ref[...] = jnp.broadcast_to(s, sum_ref.shape)
        sq_ref[...] = jnp.broadcast_to(sq, sq_ref.shape)


def _bn_relu_kernel(m_ref, scale_ref, shift_ref, o_ref):
    """y = relu(M * scale + shift) -- final layer's BN(train stats) + ReLU."""
    m = m_ref[...].astype(jnp.float32)
    o_ref[...] = jnp.maximum(m * scale_ref[...] + shift_ref[...], 0.0)


# --------------------------------------------------------------------------
# Kernel wrappers
# --------------------------------------------------------------------------
def _feature_transform(x_like, scale, shift, w_pad, n_pad, tm, fuse_bn_relu):
    """H = (relu(x*scale+shift) if fused else x) @ W, tiled on the MXU."""
    f_in_pad, f_out_pad = w_pad.shape
    tk_f = _pick_divisor_tile(f_in_pad)
    g_i = n_pad // tm
    g_k = f_in_pad // tk_f

    if fuse_bn_relu:
        kernel = _bnrelu_xw_kernel
        in_specs = [pl.BlockSpec((tm, tk_f), lambda i, k: (i, k)),
                    pl.BlockSpec((1, tk_f), lambda i, k: (0, k)),
                    pl.BlockSpec((1, tk_f), lambda i, k: (0, k)),
                    pl.BlockSpec((tk_f, f_out_pad), lambda i, k: (k, 0))]
        args = (x_like, scale.reshape(1, f_in_pad),
                shift.reshape(1, f_in_pad), w_pad)
    else:
        kernel = _xw_kernel
        in_specs = [pl.BlockSpec((tm, tk_f), lambda i, k: (i, k)),
                    pl.BlockSpec((tk_f, f_out_pad), lambda i, k: (k, 0))]
        args = (x_like, w_pad)

    return pl.pallas_call(
        kernel,
        out_shape=jax.ShapeDtypeStruct((n_pad, f_out_pad), jnp.bfloat16),
        grid_spec=pltpu.PrefetchScalarGridSpec(
            num_scalar_prefetch=0,
            grid=(g_i, g_k),
            in_specs=in_specs,
            out_specs=pl.BlockSpec((tm, f_out_pad), lambda i, k: (i, 0)),
            scratch_shapes=[pltpu.VMEM((tm, f_out_pad), jnp.float32)]),
        compiler_params=_compiler_params(("parallel", "arbitrary")),
    )(*args)


def _adj_matmul_stats(a_pad, h_pad, n, n_pad, tm, tk, h_resident, vmem_budget):
    """M = A_hat @ H (bf16 out) + masked per-row-tile BN partial sums (f32)."""
    f_pad = h_pad.shape[1]
    g_i = n_pad // tm
    g_k = n_pad // tk

    if h_resident:
        h_spec = pl.BlockSpec((n_pad, f_pad), lambda i, k: (0, 0))
        h_bytes = 2 * n_pad * f_pad * 2      # double-buffered bf16 residency
        # TODO(synk): pipeline_mode=pl.Buffered(1) on the resident H block
        # would drop the redundant second buffer (extra headroom on v7x).
    else:
        h_spec = pl.BlockSpec((tk, f_pad), lambda i, k: (k, 0))
        h_bytes = 2 * tk * f_pad * 2
    working = (h_bytes + 2 * tm * tk * 2 + tm * f_pad * 4
               + 2 * tm * f_pad * 2 + 4 * 8 * f_pad * 4)
    vmem_limit = min(vmem_budget, max(working + (4 << 20), 32 << 20))

    kernel = functools.partial(_adj_matmul_stats_kernel, n_valid=n, tm=tm,
                               tk=tk, h_resident=h_resident)
    return pl.pallas_call(
        kernel,
        out_shape=(jax.ShapeDtypeStruct((n_pad, f_pad), jnp.bfloat16),
                   jax.ShapeDtypeStruct((g_i * 8, f_pad), jnp.float32),
                   jax.ShapeDtypeStruct((g_i * 8, f_pad), jnp.float32)),
        grid_spec=pltpu.PrefetchScalarGridSpec(
            num_scalar_prefetch=0,
            grid=(g_i, g_k),
            in_specs=[pl.BlockSpec((tm, tk), lambda i, k: (i, k)),
                      h_spec],
            out_specs=[pl.BlockSpec((tm, f_pad), lambda i, k: (i, 0)),
                       pl.BlockSpec((8, f_pad), lambda i, k: (i, 0)),
                       pl.BlockSpec((8, f_pad), lambda i, k: (i, 0))],
            scratch_shapes=[pltpu.VMEM((tm, f_pad), jnp.float32)]),
        compiler_params=_compiler_params(("parallel", "arbitrary"), vmem_limit),
        cost_estimate=pl.CostEstimate(
            flops=2 * n_pad * n_pad * f_pad,
            transcendentals=0,
            bytes_accessed=(2 * n_pad * n_pad + 2 * n_pad * f_pad
                            + 2 * n_pad * f_pad + 8 * 8 * g_i * f_pad)),
    )(a_pad, h_pad)


def _bn_scale_shift(psum, psq, gamma, beta, n, f_pad):
    """Fold batch-stat BN (train mode) + gamma/beta into per-channel scale/shift."""
    f_out = gamma.shape[0]
    col_sum = jnp.sum(psum, axis=0) * 0.125      # undo 8-sublane broadcast
    col_sq = jnp.sum(psq, axis=0) * 0.125
    mean = col_sum / n
    var = jnp.maximum(col_sq / n - mean * mean, 0.0)   # clamp cancellation
    gamma_pad = jnp.zeros((f_pad,), jnp.float32).at[:f_out].set(gamma)
    beta_pad = jnp.zeros((f_pad,), jnp.float32).at[:f_out].set(beta)
    scale = gamma_pad * jax.lax.rsqrt(var + _BN_EPS)
    shift = beta_pad - mean * scale
    # NOTE: the GCNConv bias adds a per-channel constant that is removed
    # exactly by training-mode BatchNorm centering, so it folds away here.
    return scale, shift


def _bn_relu(m_pad, scale, shift, n_pad, tm):
    f_pad = m_pad.shape[1]
    g_i = n_pad // tm
    return pl.pallas_call(
        _bn_relu_kernel,
        out_shape=jax.ShapeDtypeStruct((n_pad, f_pad), jnp.float32),
        grid_spec=pltpu.PrefetchScalarGridSpec(
            num_scalar_prefetch=0,
            grid=(g_i,),
            in_specs=[pl.BlockSpec((tm, f_pad), lambda i: (i, 0)),
                      pl.BlockSpec((1, f_pad), lambda i: (0, 0)),
                      pl.BlockSpec((1, f_pad), lambda i: (0, 0))],
            out_specs=pl.BlockSpec((tm, f_pad), lambda i: (i, 0))),
        compiler_params=_compiler_params(("parallel",)),
    )(m_pad, scale.reshape(1, f_pad), shift.reshape(1, f_pad))


# --------------------------------------------------------------------------
# Glue: normalized adjacency, params, full forward
# --------------------------------------------------------------------------
def build_norm_adj(edge_index, num_nodes, edge_weight=None):
    """Dense D^{-1/2}(A + I)D^{-1/2}, matching PyG GCNConv normalization."""
    # TODO(synk): keep A_hat block-sparse and stream nonzero (tm, tk) tiles via
    # scalar-prefetched block lists for very large N (dense A is O(N^2)).
    src = edge_index[0].astype(jnp.int32)
    tgt = edge_index[1].astype(jnp.int32)
    if edge_weight is None:
        edge_weight = jnp.ones(src.shape, jnp.float32)
    loop = jnp.arange(num_nodes, dtype=jnp.int32)
    src = jnp.concatenate([src, loop])
    tgt = jnp.concatenate([tgt, loop])
    w = jnp.concatenate([edge_weight.astype(jnp.float32),
                         jnp.ones((num_nodes,), jnp.float32)])
    a = jnp.zeros((num_nodes, num_nodes), jnp.float32).at[tgt, src].add(w)
    deg = jnp.sum(a, axis=1)
    dinv = jnp.where(deg > 0, jax.lax.rsqrt(deg), 0.0)
    return dinv[:, None] * a * dinv[None, :]


def init_encoder_params(key, layer_config):
    """Glorot-uniform weights, zero bias, BN gamma=1 / beta=0 (torch defaults)."""
    params = []
    for i in range(1, len(layer_config)):
        f_in, f_out = layer_config[i - 1], layer_config[i]
        key, wk = jax.random.split(key)
        limit = (6.0 / (f_in + f_out)) ** 0.5
        w = jax.random.uniform(wk, (f_in, f_out), jnp.float32, -limit, limit)
        b = jnp.zeros((f_out,), jnp.float32)
        gamma = jnp.ones((f_out,), jnp.float32)
        beta = jnp.zeros((f_out,), jnp.float32)
        params.append((w, b, gamma, beta))
    return params


def encoder_forward(params, x, edge_index, edge_weight=None):
    # TODO(synk): BatchNorm running-mean/var tracking (momentum=0.01) is module
    # state, not part of the forward output; forward uses batch stats (train).
    n, f0 = x.shape
    widths = [f0] + [w.shape[1] for (w, _b, _g, _be) in params]
    f_pads = [_round_up(f, 128) for f in widths]
    max_f_pad = max(f_pads)

    cap = _vmem_capacity_bytes()
    budget = cap * 3 // 4

    # Gate the H-resident fast path on the actual chip's VMEM (64 MiB on v7x).
    n_pad_g, tm_g, tk_g = _pick_n_tiling(n, True)
    est_resident = (2 * n_pad_g * max_f_pad * 2 + 2 * tm_g * tk_g * 2
                    + tm_g * max_f_pad * 4 + 2 * tm_g * max_f_pad * 2)
    h_resident = est_resident + (4 << 20) <= budget
    n_pad, tm, tk = _pick_n_tiling(n, h_resident)

    a_hat = build_norm_adj(edge_index, n, edge_weight)
    a_pad = (jnp.zeros((n_pad, n_pad), jnp.float32)
             .at[:n, :n].set(a_hat).astype(jnp.bfloat16))
    # TODO(synk): on v7x an fp8(e4m3) adjacency operand would halve the
    # dominant remaining HBM stream; kept bf16 here for portability.
    x_pad = (jnp.zeros((n_pad, f_pads[0]), jnp.float32)
             .at[:n, :f0].set(x).astype(jnp.bfloat16))

    cur = x_pad            # raw input for layer 0 (no BN/ReLU yet)
    cur_scale = None
    cur_shift = None
    for l, (w, _b, gamma, beta) in enumerate(params):
        f_in, f_out = w.shape
        f_in_pad, f_out_pad = f_pads[l], f_pads[l + 1]
        w_pad = (jnp.zeros((f_in_pad, f_out_pad), jnp.float32)
                 .at[:f_in, :f_out].set(w).astype(jnp.bfloat16))

        # H = (relu(BN(M_prev)) for l>0 else X) @ W  -- fused epilogue.
        h_pad = _feature_transform(cur, cur_scale, cur_shift, w_pad,
                                   n_pad, tm, fuse_bn_relu=(l > 0))
        # M = A_hat @ H, plus masked global BN statistics.
        m_pad, psum, psq = _adj_matmul_stats(a_pad, h_pad, n, n_pad, tm, tk,
                                             h_resident, budget)
        scale, shift = _bn_scale_shift(psum, psq, gamma, beta, n, f_out_pad)
        cur, cur_scale, cur_shift = m_pad, scale, shift

    # Final layer's BN + ReLU (no next matmul to fuse into).
    y_pad = _bn_relu(cur, cur_scale, cur_shift, n_pad, tm)
    return y_pad[:n, :params[-1][0].shape[1]]


if __name__ == "__main__":
    key = jax.random.PRNGKey(0)
    k_x, k_e, k_p = jax.random.split(key, 3)

    num_nodes = 8
    layer_config = [16, 32, 8]   # input dim -> hidden -> output dim
    num_edges = 20

    x = jax.random.normal(k_x, (num_nodes, layer_config[0]), jnp.float32)
    edge_index = jax.random.randint(k_e, (2, num_edges), 0, num_nodes,
                                    dtype=jnp.int32)
    params = init_encoder_params(k_p, layer_config)

    fwd = jax.jit(encoder_forward)
    out = fwd(params, x, edge_index)
    out = jax.block_until_ready(out)
    assert out.shape == (num_nodes, layer_config[-1])
    print("KERNEL_OK")
</pallas_src>

<mosaic_0001>
module attributes {stable_mosaic.version = 11 : i64} {
  func.func @_xw_kernel(%arg0: i32, %arg1: i32, %arg2: memref<128x128xbf16, #tpu.memory_space<vmem>>, %arg3: memref<128x128xbf16, #tpu.memory_space<vmem>>, %arg4: memref<128x128xbf16, #tpu.memory_space<vmem>>, %arg5: memref<128x128xf32, #tpu.memory_space<vmem>>) attributes {dimension_semantics = [#tpu.dimension_semantics<parallel>, #tpu.dimension_semantics<arbitrary>], iteration_bounds = array<i64: 1, 1>, scalar_prefetch = 0 : i64, scratch_operands = 1 : i64, tpu.core_type = #tpu.core_type<tc>, window_params = [{transform_indices = @transform_0, window_bounds = array<i64: 128, 128>}, {transform_indices = @transform_1, window_bounds = array<i64: 128, 128>}, {transform_indices = @transform_2, window_bounds = array<i64: 128, 128>}]} {
    %c0_i32 = arith.constant 0 : i32
    %0 = arith.cmpi eq, %arg1, %c0_i32 : i32
    %1 = arith.extui %0 : i1 to i32
    %c0_i32_0 = arith.constant 0 : i32
    %2 = arith.cmpi ne, %1, %c0_i32_0 : i32
    scf.if %2 {
      %cst_10 = arith.constant 0.000000e+00 : f32
      %12 = vector.broadcast %cst_10 : f32 to vector<128x128xf32>
      %c0_11 = arith.constant 0 : index
      %c0_12 = arith.constant 0 : index
      %13 = vector.load %arg5[%c0_11, %c0_12] : memref<128x128xf32, #tpu.memory_space<vmem>>, vector<128x128xf32>
      tpu.vector_store %arg5[%c0_11, %c0_12], %12 {strides = array<i32>} : memref<128x128xf32, #tpu.memory_space<vmem>>, vector<128x128xf32>,
    } else {
    }
    %c0 = arith.constant 0 : index
    %c0_1 = arith.constant 0 : index
    %3 = vector.load %arg5[%c0, %c0_1] : memref<128x128xf32, #tpu.memory_space<vmem>>, vector<128x128xf32>
    %c0_2 = arith.constant 0 : index
    %c0_3 = arith.constant 0 : index
    %4 = vector.load %arg2[%c0_2, %c0_3] : memref<128x128xbf16, #tpu.memory_space<vmem>>, vector<128x128xbf16>
    %c0_4 = arith.constant 0 : index
    %c0_5 = arith.constant 0 : index
    %5 = vector.load %arg3[%c0_4, %c0_5] : memref<128x128xbf16, #tpu.memory_space<vmem>>, vector<128x128xbf16>
    %cst = arith.constant dense<0.000000e+00> : vector<128x128xf32>
    %6 = tpu.matmul %4, %5, %cst {dimension_numbers = #tpu.dot_dimension_numbers<[1], [0], [0], [1], [0, 0, 1, 1], [], []>} : vector<128x128xbf16>, vector<128x128xbf16>, vector<128x128xf32> -> vector<128x128xf32>
    %7 = arith.addf %3, %6 : vector<128x128xf32>
    %c0_6 = arith.constant 0 : index
    %c0_7 = arith.constant 0 : index
    %8 = vector.load %arg5[%c0_6, %c0_7] : memref<128x128xf32, #tpu.memory_space<vmem>>, vector<128x128xf32>
    tpu.vector_store %arg5[%c0_6, %c0_7], %7 {strides = array<i32>} : memref<128x128xf32, #tpu.memory_space<vmem>>, vector<128x128xf32>,
    %c0_i32_8 = arith.constant 0 : i32
    %9 = arith.cmpi eq, %arg1, %c0_i32_8 : i32
    %10 = arith.extui %9 : i1 to i32
    %c0_i32_9 = arith.constant 0 : i32
    %11 = arith.cmpi ne, %10, %c0_i32_9 : i32
    scf.if %11 {
      %c0_10 = arith.constant 0 : index
      %c0_11 = arith.constant 0 : index
      %12 = vector.load %arg5[%c0_10, %c0_11] : memref<128x128xf32, #tpu.memory_space<vmem>>, vector<128x128xf32>
      %13 = arith.truncf %12 : vector<128x128xf32> to vector<128x128xbf16>
      %c0_12 = arith.constant 0 : index
      %c0_13 = arith.constant 0 : index
      %14 = vector.load %arg4[%c0_12, %c0_13] : memref<128x128xbf16, #tpu.memory_space<vmem>>, vector<128x128xbf16>
      tpu.vector_store %arg4[%c0_12, %c0_13], %13 {strides = array<i32>} : memref<128x128xbf16, #tpu.memory_space<vmem>>, vector<128x128xbf16>,
    } else {
    }
    return
  }
  func.func @transform_0(%arg0: i32, %arg1: i32) -> (i32, i32) {
    %c0_i32 = arith.constant 0 : i32
    return %arg0, %arg1 : i32, i32
  }
  func.func @transform_1(%arg0: i32, %arg1: i32) -> (i32, i32) {
    %c0_i32 = arith.constant 0 : i32
    %c0_i32_0 = arith.constant 0 : i32
    return %arg1, %c0_i32 : i32, i32
  }
  func.func @transform_2(%arg0: i32, %arg1: i32) -> (i32, i32) {
    %c0_i32 = arith.constant 0 : i32
    %c0_i32_0 = arith.constant 0 : i32
    return %arg0, %c0_i32 : i32, i32
  }
}

module attributes {stable_mosaic.version = 11 : i64} {
  func.func @_adj_matmul_stats_kernel(%arg0: i32, %arg1: i32, %arg2: memref<128x128xbf16, #tpu.memory_space<vmem>>, %arg3: memref<128x128xbf16, #tpu.memory_space<vmem>>, %arg4: memref<128x128xbf16, #tpu.memory_space<vmem>>, %arg5: memref<8x128xf32, #tpu.memory_space<vmem>>, %arg6: memref<8x128xf32, #tpu.memory_space<vmem>>, %arg7: memref<128x128xf32, #tpu.memory_space<vmem>>) attributes {dimension_semantics = [#tpu.dimension_semantics<parallel>, #tpu.dimension_semantics<arbitrary>], iteration_bounds = array<i64: 1, 1>, scalar_prefetch = 0 : i64, scratch_operands = 1 : i64, tpu.core_type = #tpu.core_type<tc>, window_params = [{transform_indices = @transform_0, window_bounds = array<i64: 128, 128>}, {pipeline_mode = #tpu.pipeline_mode<synchronous>, transform_indices = @transform_1, window_bounds = array<i64: 128, 128>}, {transform_indices = @transform_2, window_bounds = array<i64: 128, 128>}, {transform_indices = @transform_3, window_bounds = array<i64: 8, 128>}, {transform_indices = @transform_4, window_bounds = array<i64: 8, 128>}]} {
    %c128_i32 = arith.constant 128 : i32
    %0 = arith.muli %arg0, %c128_i32 : i32
    %1 = tpu.iota {dimensions = array<i32: 0>} : vector<128x1xi32>
    %2 = vector.broadcast %0 : i32 to vector<128x1xi32>
    %3 = arith.addi %2, %1 : vector<128x1xi32>
    %c8_i32 = arith.constant 8 : i32
    %4 = vector.broadcast %c8_i32 : i32 to vector<128x1xi32>
    %5 = arith.cmpi slt, %3, %4 : vector<128x1xi32>
    %6 = arith.extui %5 : vector<128x1xi1> to vector<128x1xi32>
    %7 = arith.sitofp %6 : vector<128x1xi32> to vector<128x1xf32>
    %c0_i32 = arith.constant 0 : i32
    %8 = arith.cmpi eq, %arg1, %c0_i32 : i32
    %9 = arith.extui %8 : i1 to i32
    %c0_i32_0 = arith.constant 0 : i32
    %10 = arith.cmpi ne, %9, %c0_i32_0 : i32
    scf.if %10 {
      %cst_10 = arith.constant 0.000000e+00 : f32
      %22 = vector.broadcast %cst_10 : f32 to vector<128x128xf32>
      %c0_11 = arith.constant 0 : index
      %c0_12 = arith.constant 0 : index
      %23 = vector.load %arg7[%c0_11, %c0_12] : memref<128x128xf32, #tpu.memory_space<vmem>>, vector<128x128xf32>
      tpu.vector_store %arg7[%c0_11, %c0_12], %22 {strides = array<i32>} : memref<128x128xf32, #tpu.memory_space<vmem>>, vector<128x128xf32>,
    } else {
    }
    %c128_i32_1 = arith.constant 128 : i32
    %11 = arith.muli %arg1, %c128_i32_1 : i32
    %12 = arith.index_cast %11 : i32 to index
    %c0 = arith.constant 0 : index
    %13 = vector.load %arg3[%12, %c0] : memref<128x128xbf16, #tpu.memory_space<vmem>>, vector<128x128xbf16>
    %c0_2 = arith.constant 0 : index
    %c0_3 = arith.constant 0 : index
    %14 = vector.load %arg7[%c0_2, %c0_3] : memref<128x128xf32, #tpu.memory_space<vmem>>, vector<128x128xf32>
    %c0_4 = arith.constant 0 : index
    %c0_5 = arith.constant 0 : index
    %15 = vector.load %arg2[%c0_4, %c0_5] : memref<128x128xbf16, #tpu.memory_space<vmem>>, vector<128x128xbf16>
    %cst = arith.constant dense<0.000000e+00> : vector<128x128xf32>
    %16 = tpu.matmul %15, %13, %cst {dimension_numbers = #tpu.dot_dimension_numbers<[1], [0], [0], [1], [0, 0, 1, 1], [], []>} : vector<128x128xbf16>, vector<128x128xbf16>, vector<128x128xf32> -> vector<128x128xf32>
    %17 = arith.addf %14, %16 : vector<128x128xf32>
    %c0_6 = arith.constant 0 : index
    %c0_7 = arith.constant 0 : index
    %18 = vector.load %arg7[%c0_6, %c0_7] : memref<128x128xf32, #tpu.memory_space<vmem>>, vector<128x128xf32>
    tpu.vector_store %arg7[%c0_6, %c0_7], %17 {strides = array<i32>} : memref<128x128xf32, #tpu.memory_space<vmem>>, vector<128x128xf32>,
    %c0_i32_8 = arith.constant 0 : i32
    %19 = arith.cmpi eq, %arg1, %c0_i32_8 : i32
    %20 = arith.extui %19 : i1 to i32
    %c0_i32_9 = arith.constant 0 : i32
    %21 = arith.cmpi ne, %20, %c0_i32_9 : i32
    scf.if %21 {
      %c0_10 = arith.constant 0 : index
      %c0_11 = arith.constant 0 : index
      %22 = vector.load %arg7[%c0_10, %c0_11] : memref<128x128xf32, #tpu.memory_space<vmem>>, vector<128x128xf32>
      %23 = arith.truncf %22 : vector<128x128xf32> to vector<128x128xbf16>
      %c0_12 = arith.constant 0 : index
      %c0_13 = arith.constant 0 : index
      %24 = vector.load %arg4[%c0_12, %c0_13] : memref<128x128xbf16, #tpu.memory_space<vmem>>, vector<128x128xbf16>
      tpu.vector_store %arg4[%c0_12, %c0_13], %23 {strides = array<i32>} : memref<128x128xbf16, #tpu.memory_space<vmem>>, vector<128x128xbf16>,
      %25 = vector.broadcast %7 : vector<128x1xf32> to vector<128x128xf32>
      %26 = arith.mulf %22, %25 : vector<128x128xf32>
      %cst_14 = arith.constant dense<0.000000e+00> : vector<128xf32>
      %27 = vector.multi_reduction <add>, %26, %cst_14 [0] : vector<128x128xf32> to vector<128xf32>
      %28 = vector.shape_cast %27 : vector<128xf32> to vector<1x128xf32>
      %29 = arith.mulf %26, %26 : vector<128x128xf32>
      %cst_15 = arith.constant dense<0.000000e+00> : vector<128xf32>
      %30 = vector.multi_reduction <add>, %29, %cst_15 [0] : vector<128x128xf32> to vector<128xf32>
      %31 = vector.shape_cast %30 : vector<128xf32> to vector<1x128xf32>
      %32 = vector.shape_cast %28 : vector<1x128xf32> to vector<1x128xf32>
      %33 = vector.broadcast %32 : vector<1x128xf32> to vector<8x128xf32>
      %c0_16 = arith.constant 0 : index
      %c0_17 = arith.constant 0 : index
      %34 = vector.load %arg5[%c0_16, %c0_17] : memref<8x128xf32, #tpu.memory_space<vmem>>, vector<8x128xf32>
      tpu.vector_store %arg5[%c0_16, %c0_17], %33 {strides = array<i32>} : memref<8x128xf32, #tpu.memory_space<vmem>>, vector<8x128xf32>,
      %35 = vector.shape_cast %31 : vector<1x128xf32> to vector<1x128xf32>
      %36 = vector.broadcast %35 : vector<1x128xf32> to vector<8x128xf32>
      %c0_18 = arith.constant 0 : index
      %c0_19 = arith.constant 0 : index
      %37 = vector.load %arg6[%c0_18, %c0_19] : memref<8x128xf32, #tpu.memory_space<vmem>>, vector<8x128xf32>
      tpu.vector_store %arg6[%c0_18, %c0_19], %36 {strides = array<i32>} : memref<8x128xf32, #tpu.memory_space<vmem>>, vector<8x128xf32>,
    } else {
    }
    return
  }
  func.func @transform_0(%arg0: i32, %arg1: i32) -> (i32, i32) {
    %c0_i32 = arith.constant 0 : i32
    return %arg0, %arg1 : i32, i32
  }
  func.func @transform_1(%arg0: i32, %arg1: i32) -> (i32, i32) {
    %c0_i32 = arith.constant 0 : i32
    %c0_i32_0 = arith.constant 0 : i32
    %c0_i32_1 = arith.constant 0 : i32
    return %c0_i32, %c0_i32_0 : i32, i32
  }
  func.func @transform_2(%arg0: i32, %arg1: i32) -> (i32, i32) {
    %c0_i32 = arith.constant 0 : i32
    %c0_i32_0 = arith.constant 0 : i32
    return %arg0, %c0_i32 : i32, i32
  }
  func.func @transform_3(%arg0: i32, %arg1: i32) -> (i32, i32) {
    %c0_i32 = arith.constant 0 : i32
    %c0_i32_0 = arith.constant 0 : i32
    return %arg0, %c0_i32 : i32, i32
  }
  func.func @transform_4(%arg0: i32, %arg1: i32) -> (i32, i32) {
    %c0_i32 = arith.constant 0 : i32
    %c0_i32_0 = arith.constant 0 : i32
    return %arg0, %c0_i32 : i32, i32
  }
}

module attributes {stable_mosaic.version = 11 : i64} {
  func.func @_bnrelu_xw_kernel(%arg0: i32, %arg1: i32, %arg2: memref<128x128xbf16, #tpu.memory_space<vmem>>, %arg3: memref<1x128xf32, #tpu.memory_space<vmem>>, %arg4: memref<1x128xf32, #tpu.memory_space<vmem>>, %arg5: memref<128x128xbf16, #tpu.memory_space<vmem>>, %arg6: memref<128x128xbf16, #tpu.memory_space<vmem>>, %arg7: memref<128x128xf32, #tpu.memory_space<vmem>>) attributes {dimension_semantics = [#tpu.dimension_semantics<parallel>, #tpu.dimension_semantics<arbitrary>], iteration_bounds = array<i64: 1, 1>, scalar_prefetch = 0 : i64, scratch_operands = 1 : i64, tpu.core_type = #tpu.core_type<tc>, window_params = [{transform_indices = @transform_0, window_bounds = array<i64: 128, 128>}, {transform_indices = @transform_1, window_bounds = array<i64: 1, 128>}, {transform_indices = @transform_2, window_bounds = array<i64: 1, 128>}, {transform_indices = @transform_3, window_bounds = array<i64: 128, 128>}, {transform_indices = @transform_4, window_bounds = array<i64: 128, 128>}]} {
    %c0_i32 = arith.constant 0 : i32
    %0 = arith.cmpi eq, %arg1, %c0_i32 : i32
    %1 = arith.extui %0 : i1 to i32
    %c0_i32_0 = arith.constant 0 : i32
    %2 = arith.cmpi ne, %1, %c0_i32_0 : i32
    scf.if %2 {
      %cst_15 = arith.constant 0.000000e+00 : f32
      %22 = vector.broadcast %cst_15 : f32 to vector<128x128xf32>
      %c0_16 = arith.constant 0 : index
      %c0_17 = arith.constant 0 : index
      %23 = vector.load %arg7[%c0_16, %c0_17] : memref<128x128xf32, #tpu.memory_space<vmem>>, vector<128x128xf32>
      tpu.vector_store %arg7[%c0_16, %c0_17], %22 {strides = array<i32>} : memref<128x128xf32, #tpu.memory_space<vmem>>, vector<128x128xf32>,
    } else {
    }
    %c0 = arith.constant 0 : index
    %c0_1 = arith.constant 0 : index
    %3 = vector.load %arg2[%c0, %c0_1] : memref<128x128xbf16, #tpu.memory_space<vmem>>, vector<128x128xbf16>
    %4 = arith.extf %3 : vector<128x128xbf16> to vector<128x128xf32>
    %c0_2 = arith.constant 0 : index
    %c0_3 = arith.constant 0 : index
    %5 = vector.load %arg3[%c0_2, %c0_3] : memref<1x128xf32, #tpu.memory_space<vmem>>, vector<1x128xf32>
    %6 = vector.broadcast %5 : vector<1x128xf32> to vector<128x128xf32>
    %7 = arith.mulf %4, %6 : vector<128x128xf32>
    %c0_4 = arith.constant 0 : index
    %c0_5 = arith.constant 0 : index
    %8 = vector.load %arg4[%c0_4, %c0_5] : memref<1x128xf32, #tpu.memory_space<vmem>>, vector<1x128xf32>
    %9 = vector.broadcast %8 : vector<1x128xf32> to vector<128x128xf32>
    %10 = arith.addf %7, %9 : vector<128x128xf32>
    %cst = arith.constant 0.000000e+00 : f32
    %11 = vector.broadcast %cst : f32 to vector<128x128xf32>
    %12 = arith.maximumf %10, %11 : vector<128x128xf32>
    %13 = arith.truncf %12 : vector<128x128xf32> to vector<128x128xbf16>
    %c0_6 = arith.constant 0 : index
    %c0_7 = arith.constant 0 : index
    %14 = vector.load %arg7[%c0_6, %c0_7] : memref<128x128xf32, #tpu.memory_space<vmem>>, vector<128x128xf32>
    %c0_8 = arith.constant 0 : index
    %c0_9 = arith.constant 0 : index
    %15 = vector.load %arg5[%c0_8, %c0_9] : memref<128x128xbf16, #tpu.memory_space<vmem>>, vector<128x128xbf16>
    %cst_10 = arith.constant dense<0.000000e+00> : vector<128x128xf32>
    %16 = tpu.matmul %13, %15, %cst_10 {dimension_numbers = #tpu.dot_dimension_numbers<[1], [0], [0], [1], [0, 0, 1, 1], [], []>} : vector<128x128xbf16>, vector<128x128xbf16>, vector<128x128xf32> -> vector<128x128xf32>
    %17 = arith.addf %14, %16 : vector<128x128xf32>
    %c0_11 = arith.constant 0 : index
    %c0_12 = arith.constant 0 : index
    %18 = vector.load %arg7[%c0_11, %c0_12] : memref<128x128xf32, #tpu.memory_space<vmem>>, vector<128x128xf32>
    tpu.vector_store %arg7[%c0_11, %c0_12], %17 {strides = array<i32>} : memref<128x128xf32, #tpu.memory_space<vmem>>, vector<128x128xf32>,
    %c0_i32_13 = arith.constant 0 : i32
    %19 = arith.cmpi eq, %arg1, %c0_i32_13 : i32
    %20 = arith.extui %19 : i1 to i32
    %c0_i32_14 = arith.constant 0 : i32
    %21 = arith.cmpi ne, %20, %c0_i32_14 : i32
    scf.if %21 {
      %c0_15 = arith.constant 0 : index
      %c0_16 = arith.constant 0 : index
      %22 = vector.load %arg7[%c0_15, %c0_16] : memref<128x128xf32, #tpu.memory_space<vmem>>, vector<128x128xf32>
      %23 = arith.truncf %22 : vector<128x128xf32> to vector<128x128xbf16>
      %c0_17 = arith.constant 0 : index
      %c0_18 = arith.constant 0 : index
      %24 = vector.load %arg6[%c0_17, %c0_18] : memref<128x128xbf16, #tpu.memory_space<vmem>>, vector<128x128xbf16>
      tpu.vector_store %arg6[%c0_17, %c0_18], %23 {strides = array<i32>} : memref<128x128xbf16, #tpu.memory_space<vmem>>, vector<128x128xbf16>,
    } else {
    }
    return
  }
  func.func @transform_0(%arg0: i32, %arg1: i32) -> (i32, i32) {
    %c0_i32 = arith.constant 0 : i32
    return %arg0, %arg1 : i32, i32
  }
  func.func @transform_1(%arg0: i32, %arg1: i32) -> (i32, i32) {
    %c0_i32 = arith.constant 0 : i32
    %c0_i32_0 = arith.constant 0 : i32
    return %c0_i32, %arg1 : i32, i32
  }
  func.func @transform_2(%arg0: i32, %arg1: i32) -> (i32, i32) {
    %c0_i32 = arith.constant 0 : i32
    %c0_i32_0 = arith.constant 0 : i32
    return %c0_i32, %arg1 : i32, i32
  }
  func.func @transform_3(%arg0: i32, %arg1: i32) -> (i32, i32) {
    %c0_i32 = arith.constant 0 : i32
    %c0_i32_0 = arith.constant 0 : i32
    return %arg1, %c0_i32 : i32, i32
  }
  func.func @transform_4(%arg0: i32, %arg1: i32) -> (i32, i32) {
    %c0_i32 = arith.constant 0 : i32
    %c0_i32_0 = arith.constant 0 : i32
    return %arg0, %c0_i32 : i32, i32
  }
}

module attributes {stable_mosaic.version = 11 : i64} {
  func.func @_bn_relu_kernel(%arg0: i32, %arg1: memref<128x128xbf16, #tpu.memory_space<vmem>>, %arg2: memref<1x128xf32, #tpu.memory_space<vmem>>, %arg3: memref<1x128xf32, #tpu.memory_space<vmem>>, %arg4: memref<128x128xf32, #tpu.memory_space<vmem>>) attributes {dimension_semantics = [#tpu.dimension_semantics<parallel>], iteration_bounds = array<i64: 1>, scalar_prefetch = 0 : i64, scratch_operands = 0 : i64, tpu.core_type = #tpu.core_type<tc>, window_params = [{transform_indices = @transform_0, window_bounds = array<i64: 128, 128>}, {pipeline_mode = #tpu.pipeline_mode<synchronous>, transform_indices = @transform_1, window_bounds = array<i64: 1, 128>}, {pipeline_mode = #tpu.pipeline_mode<synchronous>, transform_indices = @transform_2, window_bounds = array<i64: 1, 128>}, {transform_indices = @transform_3, window_bounds = array<i64: 128, 128>}]} {
    %c0 = arith.constant 0 : index
    %c0_0 = arith.constant 0 : index
    %0 = vector.load %arg1[%c0, %c0_0] : memref<128x128xbf16, #tpu.memory_space<vmem>>, vector<128x128xbf16>
    %1 = arith.extf %0 : vector<128x128xbf16> to vector<128x128xf32>
    %c0_1 = arith.constant 0 : index
    %c0_2 = arith.constant 0 : index
    %2 = vector.load %arg2[%c0_1, %c0_2] : memref<1x128xf32, #tpu.memory_space<vmem>>, vector<1x128xf32>
    %3 = vector.broadcast %2 : vector<1x128xf32> to vector<128x128xf32>
    %4 = arith.mulf %1, %3 : vector<128x128xf32>
    %c0_3 = arith.constant 0 : index
    %c0_4 = arith.constant 0 : index
    %5 = vector.load %arg3[%c0_3, %c0_4] : memref<1x128xf32, #tpu.memory_space<vmem>>, vector<1x128xf32>
    %6 = vector.broadcast %5 : vector<1x128xf32> to vector<128x128xf32>
    %7 = arith.addf %4, %6 : vector<128x128xf32>
    %cst = arith.constant 0.000000e+00 : f32
    %8 = vector.broadcast %cst : f32 to vector<128x128xf32>
    %9 = arith.maximumf %7, %8 : vector<128x128xf32>
    %c0_5 = arith.constant 0 : index
    %c0_6 = arith.constant 0 : index
    %10 = vector.load %arg4[%c0_5, %c0_6] : memref<128x128xf32, #tpu.memory_space<vmem>>, vector<128x128xf32>
    tpu.vector_store %arg4[%c0_5, %c0_6], %9 {strides = array<i32>} : memref<128x128xf32, #tpu.memory_space<vmem>>, vector<128x128xf32>,
    return
  }
  func.func @transform_0(%arg0: i32) -> (i32, i32) {
    %c0_i32 = arith.constant 0 : i32
    %c0_i32_0 = arith.constant 0 : i32
    return %arg0, %c0_i32 : i32, i32
  }
  func.func @transform_1(%arg0: i32) -> (i32, i32) {
    %c0_i32 = arith.constant 0 : i32
    %c0_i32_0 = arith.constant 0 : i32
    %c0_i32_1 = arith.constant 0 : i32
    return %c0_i32, %c0_i32_0 : i32, i32
  }
  func.func @transform_2(%arg0: i32) -> (i32, i32) {
    %c0_i32 = arith.constant 0 : i32
    %c0_i32_0 = arith.constant 0 : i32
    %c0_i32_1 = arith.constant 0 : i32
    return %c0_i32, %c0_i32_0 : i32, i32
  }
  func.func @transform_3(%arg0: i32) -> (i32, i32) {
    %c0_i32 = arith.constant 0 : i32
    %c0_i32_0 = arith.constant 0 : i32
    return %arg0, %c0_i32 : i32, i32
  }
}

</mosaic_0001>

<bundles_post_ra>
// kernel: encoder_forward.5
= control target key start
LH: loop header
LB: loop body
LE: loop exit
PB: predicated region body
PF: predicated region fallthrough
CT: control target
= control target key end

     0   :  { %s670_s1 = inlined_call_operand.vmem [shape: bf16[128,128], index: 1, kind: input, shape index: {}]   ;;  %s671_s0 = inlined_call_operand.vmem [shape: bf16[128,128], index: 0, kind: input, shape index: {}]   ;;  %s672_s2 = inlined_call_operand.vmem [shape: bf16[128,128], index: 2, kind: output, shape index: {}]  }
   0x1   :  { %v567_v0 = vld [vmem:[%s670_s1] sm:$0xff]   ;;  %v568_v1 = vld [vmem:[%s670_s1 + $0x8] sm:$0xff]   ;;  %v569_v2 = vld [vmem:[%s670_s1 + $0x10] sm:$0xff]  }
   0x2   :  { %519 = vmatprep.subr.bf16.mxu0 %v567_v0  ;;  %551 = vmatprep.subr.bf16.mxu1 %v567_v0  ;;  %v570_v3 = vld [vmem:[%s670_s1 + $0x18] sm:$0xff]   ;;  %v575_v4 = vld [vmem:[%s671_s0] sm:$0xff]   ;;  %v572_v7 = vld [vmem:[%s670_s1 + $0x28] sm:$0xff]  }
   0x3   :  { %520 = vmatpush3.bf16.msra.mxu0 %v567_v0  ;;  %559 = vmatpush3.bf16.msra.mxu1 %v567_v0  ;;  %v576_v5 = vld [vmem:[%s671_s0 + $0x20] sm:$0xff]   ;;  %v573_v8 = vld [vmem:[%s670_s1 + $0x30] sm:$0xff]   ;;  %v574_v9 = vld [vmem:[%s670_s1 + $0x38] sm:$0xff]  }
   0x4   :  { %521 = vmatprep.subr.bf16.mxu0 %v568_v1  ;;  %552 = vmatprep.subr.bf16.mxu1 %v568_v1  ;;  %v571_v6 = vld [vmem:[%s670_s1 + $0x20] sm:$0xff]   ;;  %v577_v10 = vld [vmem:[%s671_s0 + $0x8] sm:$0xff]   ;;  %v579_v12 = vld [vmem:[%s671_s0 + $0x10] sm:$0xff]  }
   0x5   :  { %535 = vmatprep.mubr.bf16.mxu0 %v575_v4  ;;  %543 = vmatprep.mubr.bf16.mxu1 %v576_v5  ;;  %v578_v11 = vld [vmem:[%s671_s0 + $0x28] sm:$0xff]   ;;  %v580_v13 = vld [vmem:[%s671_s0 + $0x30] sm:$0xff]   ;;  %v581_v14 = vld [vmem:[%s671_s0 + $0x18] sm:$0xff]  }
   0x6   :  { %v582_v15 = vld [vmem:[%s671_s0 + $0x38] sm:$0xff]  }
   0x7   :  { %522 = vmatpush3.bf16.msra.mxu0 %v568_v1  ;;  %560 = vmatpush3.bf16.msra.mxu1 %v568_v1 }
   0x8   :  { %523 = vmatprep.subr.bf16.mxu0 %v569_v2  ;;  %553 = vmatprep.subr.bf16.mxu1 %v569_v2 }
   0xb   :  { %524 = vmatpush3.bf16.msra.mxu0 %v569_v2  ;;  %561 = vmatpush3.bf16.msra.mxu1 %v569_v2 }
   0xc   :  { %525 = vmatprep.subr.bf16.mxu0 %v570_v3  ;;  %554 = vmatprep.subr.bf16.mxu1 %v570_v3 }
   0xf   :  { %526 = vmatpush3.bf16.msra.mxu0 %v570_v3  ;;  %562 = vmatpush3.bf16.msra.mxu1 %v570_v3 }
  0x10   :  { %527 = vmatprep.subr.bf16.mxu0 %v571_v6  ;;  %555 = vmatprep.subr.bf16.mxu1 %v571_v6 }
  0x13   :  { %528 = vmatpush3.bf16.msra.mxu0 %v571_v6  ;;  %563 = vmatpush3.bf16.msra.mxu1 %v571_v6 }
  0x14   :  { %529 = vmatprep.subr.bf16.mxu0 %v572_v7  ;;  %556 = vmatprep.subr.bf16.mxu1 %v572_v7 }
  0x17   :  { %530 = vmatpush3.bf16.msra.mxu0 %v572_v7  ;;  %564 = vmatpush3.bf16.msra.mxu1 %v572_v7 }
  0x18   :  { %531 = vmatprep.subr.bf16.mxu0 %v573_v8  ;;  %557 = vmatprep.subr.bf16.mxu1 %v573_v8 }
  0x1b   :  { %532 = vmatpush3.bf16.msra.mxu0 %v573_v8  ;;  %565 = vmatpush3.bf16.msra.mxu1 %v573_v8 }
  0x1c   :  { %533 = vmatprep.subr.bf16.mxu0 %v574_v9  ;;  %558 = vmatprep.subr.bf16.mxu1 %v574_v9 }
  0x1f   :  { %534 = vmatpush3.bf16.msra.mxu0 %v574_v9  ;;  %566 = vmatpush3.bf16.msra.mxu1 %v574_v9 }
  0x22   :  { %536 = vmatmul.mubr.bf16.vlgmr.msra.gmra.mrb[0].mxu0 %v577_v10  ;;  %544 = vmatmul.mubr.bf16.vlgmr.msra.gmra.mrb[0].mxu1 %v578_v11 }
  0x23   :  { %539 = vmatprep.mubr.bf16.mxu0 %v579_v12  ;;  %547 = vmatprep.mubr.bf16.mxu1 %v580_v13 }
  0x2a   :  { %540 = vmatmul.mubr.bf16.gmra.mrb[4].mxu0 %v581_v14  ;;  %548 = vmatmul.mubr.bf16.gmra.mrb[4].mxu1 %v582_v15 }
  0xf5   :  { %v537_v16 = vpop.f32.mrb[0].mxu0  ;;  %v545_v17 = vpop.f32.mrb[0].mxu1 }
  0xf6   :  { %v210_v18 = vpop.f32.mrb[1].mxu0  ;;  %v242_v19 = vpop.f32.mrb[1].mxu1 }
  0xf7   :  { %v538_v20 = vpop.f32.mrb[2].mxu0  ;;  %v546_v21 = vpop.f32.mrb[2].mxu1 }
  0xf8   :  { %v464_v22 = vpack.c.bf16 %v538_v20, %v537_v16  ;;  %v484_v23 = vpack.c.bf16 %v546_v21, %v545_v17  ;;  %v213_v24 = vpop.f32.mrb[3].mxu0  ;;  %v245_v25 = vpop.f32.mrb[3].mxu1 }
  0xf9   :  { %v459_v26 = vpack.c.bf16 %v213_v24, %v210_v18  ;;  %v479_v27 = vpack.c.bf16 %v245_v25, %v242_v19 }
  0xfa   :  { %496 = vst [vmem:[%s672_s2 + $0x8] sm:$0xff] %v464_v22   ;;  %500 = vst [vmem:[%s672_s2 + $0x28] sm:$0xff] %v484_v23  }
  0xfb   :  { %460 = vst [vmem:[%s672_s2] sm:$0xff] %v459_v26   ;;  %499 = vst [vmem:[%s672_s2 + $0x20] sm:$0xff] %v479_v27  }
  0xfd   :  { %v541_v28 = vpop.f32.mrb[4].mxu0  ;;  %v549_v29 = vpop.f32.mrb[4].mxu1 }
  0xfe   :  { %v226_v30 = vpop.f32.mrb[5].mxu0  ;;  %v258_v31 = vpop.f32.mrb[5].mxu1 }
  0xff   :  { %v542_v32 = vpop.f32.mrb[6].mxu0  ;;  %v550_v33 = vpop.f32.mrb[6].mxu1 }
 0x100   :  { %v474_v34 = vpack.c.bf16 %v542_v32, %v541_v28  ;;  %v494_v35 = vpack.c.bf16 %v550_v33, %v549_v29  ;;  %v229_v36 = vpop.f32.mrb[7].mxu0  ;;  %v261_v37 = vpop.f32.mrb[7].mxu1 }
 0x101   :  { %v469_v38 = vpack.c.bf16 %v229_v36, %v226_v30  ;;  %v489_v39 = vpack.c.bf16 %v261_v37, %v258_v31 }
 0x102   :  { %498 = vst [vmem:[%s672_s2 + $0x18] sm:$0xff] %v474_v34   ;;  %502 = vst [vmem:[%s672_s2 + $0x38] sm:$0xff] %v494_v35  }
 0x103   :  { %497 = vst [vmem:[%s672_s2 + $0x10] sm:$0xff] %v469_v38   ;;  %501 = vst [vmem:[%s672_s2 + $0x30] sm:$0xff] %v489_v39  }

// kernel: encoder_forward.6
= control target key start
LH: loop header
LB: loop body
LE: loop exit
PB: predicated region body
PF: predicated region fallthrough
CT: control target
= control target key end

     0   :  { %s863_s1 = inlined_call_operand.vmem [shape: bf16[128,128], index: 1, kind: input, shape index: {}]   ;;  %s864_s0 = inlined_call_operand.vmem [shape: bf16[128,128], index: 0, kind: input, shape index: {}]   ;;  %s865_s2 = inlined_call_operand.vmem [shape: bf16[128,128], index: 2, kind: output, shape index: {0}]   ;;  %s866_s3 = inlined_call_operand.vmem [shape: f32[8,128], index: 3, kind: output, shape index: {1}]   ;;  %s867_s4 = inlined_call_operand.vmem [shape: f32[8,128], index: 4, kind: output, shape index: {2}]  }
   0x1   :  { %v744_v0 = vld [vmem:[%s863_s1] sm:$0xff]   ;;  %v745_v1 = vld [vmem:[%s863_s1 + $0x8] sm:$0xff]   ;;  %v746_v2 = vld [vmem:[%s863_s1 + $0x10] sm:$0xff]  }
   0x2   :  { %696 = vmatprep.subr.bf16.mxu0 %v744_v0  ;;  %728 = vmatprep.subr.bf16.mxu1 %v744_v0  ;;  %v747_v3 = vld [vmem:[%s863_s1 + $0x18] sm:$0xff]   ;;  %v752_v4 = vld [vmem:[%s864_s0] sm:$0xff]   ;;  %v749_v7 = vld [vmem:[%s863_s1 + $0x28] sm:$0xff]  }
   0x3   :  { %697 = vmatpush3.bf16.msra.mxu0 %v744_v0  ;;  %736 = vmatpush3.bf16.msra.mxu1 %v744_v0  ;;  %v748_v5 = vld [vmem:[%s863_s1 + $0x20] sm:$0xff]   ;;  %v750_v8 = vld [vmem:[%s863_s1 + $0x30] sm:$0xff]   ;;  %v751_v9 = vld [vmem:[%s863_s1 + $0x38] sm:$0xff]  }
   0x4   :  { %698 = vmatprep.subr.bf16.mxu0 %v745_v1  ;;  %729 = vmatprep.subr.bf16.mxu1 %v745_v1  ;;  %v756_v6 = vld [vmem:[%s864_s0 + $0x20] sm:$0xff]   ;;  %v753_v10 = vld [vmem:[%s864_s0 + $0x8] sm:$0xff]   ;;  %v754_v12 = vld [vmem:[%s864_s0 + $0x10] sm:$0xff]  }
   0x5   :  { %712 = vmatprep.mubr.bf16.mxu0 %v752_v4  ;;  %720 = vmatprep.mubr.bf16.mxu1 %v756_v6  ;;  %v757_v11 = vld [vmem:[%s864_s0 + $0x28] sm:$0xff]   ;;  %v758_v13 = vld [vmem:[%s864_s0 + $0x30] sm:$0xff]   ;;  %v755_v14 = vld [vmem:[%s864_s0 + $0x18] sm:$0xff]  }
   0x6   :  { %v759_v15 = vld [vmem:[%s864_s0 + $0x38] sm:$0xff]  }
   0x7   :  { %699 = vmatpush3.bf16.msra.mxu0 %v745_v1  ;;  %737 = vmatpush3.bf16.msra.mxu1 %v745_v1 }
   0x8   :  { %700 = vmatprep.subr.bf16.mxu0 %v746_v2  ;;  %730 = vmatprep.subr.bf16.mxu1 %v746_v2 }
   0xb   :  { %701 = vmatpush3.bf16.msra.mxu0 %v746_v2  ;;  %738 = vmatpush3.bf16.msra.mxu1 %v746_v2 }
   0xc   :  { %702 = vmatprep.subr.bf16.mxu0 %v747_v3  ;;  %731 = vmatprep.subr.bf16.mxu1 %v747_v3 }
   0xf   :  { %703 = vmatpush3.bf16.msra.mxu0 %v747_v3  ;;  %739 = vmatpush3.bf16.msra.mxu1 %v747_v3 }
  0x10   :  { %704 = vmatprep.subr.bf16.mxu0 %v748_v5  ;;  %732 = vmatprep.subr.bf16.mxu1 %v748_v5 }
  0x13   :  { %705 = vmatpush3.bf16.msra.mxu0 %v748_v5  ;;  %740 = vmatpush3.bf16.msra.mxu1 %v748_v5 }
  0x14   :  { %706 = vmatprep.subr.bf16.mxu0 %v749_v7  ;;  %733 = vmatprep.subr.bf16.mxu1 %v749_v7 }
  0x17   :  { %707 = vmatpush3.bf16.msra.mxu0 %v749_v7  ;;  %741 = vmatpush3.bf16.msra.mxu1 %v749_v7 }
  0x18   :  { %708 = vmatprep.subr.bf16.mxu0 %v750_v8  ;;  %734 = vmatprep.subr.bf16.mxu1 %v750_v8 }
  0x1b   :  { %709 = vmatpush3.bf16.msra.mxu0 %v750_v8  ;;  %742 = vmatpush3.bf16.msra.mxu1 %v750_v8 }
  0x1c   :  { %710 = vmatprep.subr.bf16.mxu0 %v751_v9  ;;  %735 = vmatprep.subr.bf16.mxu1 %v751_v9 }
  0x1f   :  { %711 = vmatpush3.bf16.msra.mxu0 %v751_v9  ;;  %743 = vmatpush3.bf16.msra.mxu1 %v751_v9 }
  0x22   :  { %713 = vmatmul.mubr.bf16.vlgmr.msra.gmra.mrb[0].mxu0 %v753_v10  ;;  %721 = vmatmul.mubr.bf16.vlgmr.msra.gmra.mrb[0].mxu1 %v757_v11 }
  0x23   :  { %716 = vmatprep.mubr.bf16.mxu0 %v754_v12  ;;  %724 = vmatprep.mubr.bf16.mxu1 %v758_v13 }
  0x2a   :  { %717 = vmatmul.mubr.bf16.gmra.mrb[4].mxu0 %v755_v14  ;;  %725 = vmatmul.mubr.bf16.gmra.mrb[4].mxu1 %v759_v15 }
  0xf5   :  { %v714_v16 = vpop.f32.mrb[0].mxu0  ;;  %v722_v17 = vpop.f32.mrb[0].mxu1 }
  0xf6   :  { %v301_v18 = vpop.f32.mrb[1].mxu0  ;;  %v333_v19 = vpop.f32.mrb[1].mxu1  ;;  %v497_v25 = vmul.f32 0.0, %v714_v16  ;;  %v505_v7 = vmul.f32 0.0, %v722_v17 }
  0xf7   :  { %v715_v20 = vpop.f32.mrb[2].mxu0  ;;  %v723_v21 = vpop.f32.mrb[2].mxu1  ;;  %v532_v30 = vmul.f32 %v301_v18, %v301_v18  ;;  %v503_v58 = vmul.f32 0.0, %v333_v19 }
  0xf8   :  { %v641_v22 = vpack.c.bf16 %v715_v20, %v714_v16  ;;  %v304_v23 = vpop.f32.mrb[3].mxu0  ;;  %v336_v24 = vpop.f32.mrb[3].mxu1  ;;  %v661_v28 = vpack.c.bf16 %v723_v21, %v722_v17  ;;  %v498_v31 = vmul.f32 0.0, %v715_v20  ;;  %v534_v34 = vmul.f32 %v497_v25, %v497_v25 }
  0xf9   :  { %v636_v26 = vpack.c.bf16 %v304_v23, %v301_v18  ;;  %v496_v27 = vmul.f32 0.0, %v304_v23  ;;  %v656_v29 = vpack.c.bf16 %v336_v24, %v333_v19  ;;  %v540_v2 = vmul.f32 %v503_v58, %v503_v58 }
  0xfa   :  { %673 = vst [vmem:[%s865_s2 + $0x8] sm:$0xff] %v641_v22   ;;  %677 = vst [vmem:[%s865_s2 + $0x28] sm:$0xff] %v661_v28   ;;  %v535_v41 = vmul.f32 %v498_v31, %v498_v31  ;;  %v504_v6 = vmul.f32 0.0, %v336_v24  ;;  %v506_v10 = vmul.f32 0.0, %v723_v21  ;;  %v542_v15 = vmul.f32 %v505_v7, %v505_v7 }
  0xfb   :  { %637 = vst [vmem:[%s865_s2] sm:$0xff] %v636_v26   ;;  %v511_v32 = vadd.f32 %v496_v27, %v301_v18  ;;  %v533_v33 = vmul.f32 %v496_v27, %v496_v27  ;;  %676 = vst [vmem:[%s865_s2 + $0x20] sm:$0xff] %v656_v29  }
  0xfc   :  { %v541_v13 = vmul.f32 %v504_v6, %v504_v6  ;;  %v543_v19 = vmul.f32 %v506_v10, %v506_v10 }
  0xfd   :  { %v512_v35 = vadd.f32 %v511_v32, %v497_v25  ;;  %v548_v36 = vadd.f32 %v533_v33, %v532_v30  ;;  %v718_v37 = vpop.f32.mrb[4].mxu0  ;;  %v726_v38 = vpop.f32.mrb[4].mxu1 }
  0xfe   :  { %v317_v39 = vpop.f32.mrb[5].mxu0  ;;  %v349_v40 = vpop.f32.mrb[5].mxu1  ;;  %v501_v54 = vmul.f32 0.0, %v718_v37  ;;  %v509_v26 = vmul.f32 0.0, %v726_v38 }
  0xff   :  { %v549_v42 = vadd.f32 %v548_v36, %v534_v34  ;;  %v499_v43 = vmul.f32 0.0, %v317_v39  ;;  %v513_v44 = vadd.f32 %v512_v35, %v498_v31  ;;  %v719_v45 = vpop.f32.mrb[6].mxu0  ;;  %v727_v46 = vpop.f32.mrb[6].mxu1  ;;  %v507_v14 = vmul.f32 0.0, %v349_v40 }
 0x100   :  { %v651_v47 = vpack.c.bf16 %v719_v45, %v718_v37  ;;  %v320_v48 = vpop.f32.mrb[7].mxu0  ;;  %v352_v49 = vpop.f32.mrb[7].mxu1  ;;  %v671_v56 = vpack.c.bf16 %v727_v46, %v726_v38  ;;  %v502_v60 = vmul.f32 0.0, %v719_v45  ;;  %v538_v63 = vmul.f32 %v501_v54, %v501_v54 }
 0x101   :  { %v514_v50 = vadd.f32 %v513_v44, %v499_v43  ;;  %v536_v51 = vmul.f32 %v499_v43, %v499_v43  ;;  %v550_v52 = vadd.f32 %v549_v42, %v535_v41  ;;  %v646_v53 = vpack.c.bf16 %v320_v48, %v317_v39 }
 0x102   :  { %675 = vst [vmem:[%s865_s2 + $0x18] sm:$0xff] %v651_v47   ;;  %v500_v55 = vmul.f32 0.0, %v320_v48  ;;  %v666_v59 = vpack.c.bf16 %v352_v49, %v349_v40  ;;  %679 = vst [vmem:[%s865_s2 + $0x38] sm:$0xff] %v671_v56   ;;  %v539_v3 = vmul.f32 %v502_v60, %v502_v60  ;;  %v544_v23 = vmul.f32 %v507_v14, %v507_v14 }
 0x103   :  { %v551_v57 = vadd.f32 %v550_v52, %v536_v51  ;;  %674 = vst [vmem:[%s865_s2 + $0x10] sm:$0xff] %v646_v53   ;;  %v508_v25 = vmul.f32 0.0, %v352_v49  ;;  %v510_v17 = vmul.f32 0.0, %v727_v46  ;;  %v546_v21 = vmul.f32 %v509_v26, %v509_v26 }
 0x104   :  { %v515_v61 = vadd.f32 %v514_v50, %v500_v55  ;;  %v537_v62 = vmul.f32 %v500_v55, %v500_v55  ;;  %678 = vst [vmem:[%s865_s2 + $0x30] sm:$0xff] %v666_v59  }
 0x105   :  { %v545_v30 = vmul.f32 %v508_v25, %v508_v25  ;;  %v547_v33 = vmul.f32 %v510_v17, %v510_v17 }
 0x106   :  { %v516_v0 = vadd.f32 %v515_v61, %v501_v54  ;;  %v552_v1 = vadd.f32 %v551_v57, %v537_v62 }
 0x108   :  { %v553_v4 = vadd.f32 %v552_v1, %v538_v63  ;;  %v517_v5 = vadd.f32 %v516_v0, %v502_v60 }
 0x10a   :  { %v518_v8 = vadd.f32 %v517_v5, %v503_v58  ;;  %v554_v9 = vadd.f32 %v553_v4, %v539_v3 }
 0x10c   :  { %v555_v11 = vadd.f32 %v554_v9, %v540_v2  ;;  %v519_v12 = vadd.f32 %v518_v8, %v504_v6 }
 0x10e   :  { %v520_v16 = vadd.f32 %v519_v12, %v505_v7  ;;  %v556_v18 = vadd.f32 %v555_v11, %v541_v13 }
 0x110   :  { %v557_v20 = vadd.f32 %v556_v18, %v542_v15  ;;  %v521_v22 = vadd.f32 %v520_v16, %v506_v10 }
 0x112   :  { %v522_v27 = vadd.f32 %v521_v22, %v507_v14  ;;  %v558_v28 = vadd.f32 %v557_v20, %v543_v19 }
 0x114   :  { %v559_v24 = vadd.f32 %v558_v28, %v544_v23  ;;  %v523_v29 = vadd.f32 %v522_v27, %v508_v25 }
 0x116   :  { %v524_v31 = vadd.f32 %v523_v29, %v509_v26  ;;  %v560_v32 = vadd.f32 %v559_v24, %v545_v30 }
 0x118   :  { %v525_v34 = vadd.f32 %v524_v31, %v510_v17  ;;  %v561_v35 = vadd.f32 %v560_v32, %v546_v21 }
 0x11a   :  { %v526_v36 = vrot.slane %v525_v34, 4  ;;  %v562_v37 = vadd.f32 %v561_v35, %v547_v33 }
 0x11c   :  { %v527_v39 = vadd.f32 %v526_v36, %v525_v34  ;;  %v563_v40 = vrot.slane %v562_v37, 4 }
 0x11e   :  { %v528_v41 = vrot.slane %v527_v39, 2  ;;  %v564_v42 = vadd.f32 %v563_v40, %v562_v37 }
 0x120   :  { %v529_v43 = vadd.f32 %v528_v41, %v527_v39  ;;  %v565_v38 = vrot.slane %v564_v42, 2 }
 0x122   :  { %v530_v44 = vrot.slane %v529_v43, 1  ;;  %v566_v45 = vadd.f32 %v565_v38, %v564_v42 }
 0x124   :  { %v531_v47 = vadd.f32 %v530_v44, %v529_v43  ;;  %v567_v46 = vrot.slane %v566_v45, 1 }
 0x126   :  { %v568_v48 = vadd.f32 %v567_v46, %v566_v45  ;;  %569 = vst [vmem:[%s866_s3] sm:$0xff] %v531_v47 }
 0x128   :  { %570 = vst [vmem:[%s867_s4] sm:$0xff] %v568_v48 }

// kernel: encoder_forward.7
= control target key start
LH: loop header
LB: loop body
LE: loop exit
PB: predicated region body
PF: predicated region fallthrough
CT: control target
= control target key end

     0   :  { %s791_s3 = inlined_call_operand.vmem [shape: bf16[128,128], index: 3, kind: input, shape index: {}]   ;;  %s792_s0 = inlined_call_operand.vmem [shape: bf16[128,128], index: 0, kind: input, shape index: {}]   ;;  %s793_s1 = inlined_call_operand.vmem [shape: f32[1,128], index: 1, kind: input, shape index: {}]   ;;  %s794_s2 = inlined_call_operand.vmem [shape: f32[1,128], index: 2, kind: input, shape index: {}]   ;;  %s795_s4 = inlined_call_operand.vmem [shape: bf16[128,128], index: 4, kind: output, shape index: {}]  }
   0x1   :  { %v644_v0 = vld [vmem:[%s791_s3] sm:$0xff]   ;;  %v645_v1 = vld [vmem:[%s791_s3 + $0x8] sm:$0xff]   ;;  %v646_v2 = vld [vmem:[%s791_s3 + $0x10] sm:$0xff]  }
   0x2   :  { %596 = vmatprep.subr.bf16.mxu0 %v644_v0  ;;  %628 = vmatprep.subr.bf16.mxu1 %v644_v0  ;;  %v647_v3 = vld [vmem:[%s791_s3 + $0x18] sm:$0xff]   ;;  %v495_v4 = vld [vmem:[%s792_s0] sm:$0xff]   ;;  %v566_v9 = vld [vmem:[%s792_s0 + $0x8] sm:$0xff]  }
   0x3   :  { %597 = vmatpush3.bf16.msra.mxu0 %v644_v0  ;;  %636 = vmatpush3.bf16.msra.mxu1 %v644_v0  ;;  %v695_v5 = vld [vmem:[%s793_s1] ss:$0 sm:$0xff]  ;;  %v496_v6 = vunpack.c.l.bf16 %v495_v4  ;;  %v497_v7 = vunpack.c.h.bf16 %v495_v4  ;;  %v570_v13 = vld [vmem:[%s792_s0 + $0x28] sm:$0xff]   ;;  %v567_v16 = vld [vmem:[%s792_s0 + $0x10] sm:$0xff]   ;;  %v500_v20 = vunpack.c.l.bf16 %v566_v9  ;;  %v501_v21 = vunpack.c.h.bf16 %v566_v9 }
   0x4   :  { %598 = vmatprep.subr.bf16.mxu0 %v645_v1  ;;  %629 = vmatprep.subr.bf16.mxu1 %v645_v1  ;;  %v569_v8 = vld [vmem:[%s792_s0 + $0x20] sm:$0xff]   ;;  %v516_v24 = vunpack.c.l.bf16 %v570_v13  ;;  %v517_v25 = vunpack.c.h.bf16 %v570_v13  ;;  %v504_v28 = vunpack.c.l.bf16 %v567_v16  ;;  %v571_v31 = vld [vmem:[%s792_s0 + $0x30] sm:$0xff]   ;;  %v649_v32 = vld [vmem:[%s791_s3 + $0x28] sm:$0xff]   ;;  %v505_v40 = vunpack.c.h.bf16 %v567_v16 }
   0x5   :  { %v706_v10 = vld [vmem:[%s794_s2] ss:$0 sm:$0xff]  ;;  %v512_v11 = vunpack.c.l.bf16 %v569_v8  ;;  %v513_v12 = vunpack.c.h.bf16 %v569_v8  ;;  %v77_v14 = vmul.f32 %v496_v6, %v695_v5  ;;  %v78_v15 = vmul.f32 %v497_v7, %v695_v5  ;;  %v568_v44 = vld [vmem:[%s792_s0 + $0x18] sm:$0xff]   ;;  %v650_v48 = vld [vmem:[%s791_s3 + $0x30] sm:$0xff]  }
   0x6   :  { %v648_v17 = vld [vmem:[%s791_s3 + $0x20] sm:$0xff]   ;;  %v79_v35 = vmul.f32 %v500_v20, %v695_v5  ;;  %v80_v36 = vmul.f32 %v501_v21, %v695_v5  ;;  %v87_v38 = vmul.f32 %v516_v24, %v695_v5  ;;  %v88_v39 = vmul.f32 %v517_v25, %v695_v5  ;;  %v572_v47 = vld [vmem:[%s792_s0 + $0x38] sm:$0xff]  }
   0x7   :  { %599 = vmatpush3.bf16.msra.mxu0 %v645_v1  ;;  %637 = vmatpush3.bf16.msra.mxu1 %v645_v1  ;;  %v85_v18 = vmul.f32 %v512_v11, %v695_v5  ;;  %v86_v19 = vmul.f32 %v513_v12, %v695_v5  ;;  %v100_v22 = vadd.f32 %v706_v10, %v77_v14  ;;  %v520_v43 = vunpack.c.l.bf16 %v571_v31  ;;  %v651_v63 = vld [vmem:[%s791_s3 + $0x38] sm:$0xff]  }
   0x8   :  { %600 = vmatprep.subr.bf16.mxu0 %v646_v2  ;;  %630 = vmatprep.subr.bf16.mxu1 %v646_v2  ;;  %v101_v23 = vadd.f32 %v706_v10, %v78_v15  ;;  %v81_v42 = vmul.f32 %v504_v28, %v695_v5  ;;  %v82_v45 = vmul.f32 %v505_v40, %v695_v5  ;;  %v521_v46 = vunpack.c.h.bf16 %v571_v31 }
   0x9   :  { %v108_v26 = vadd.f32 %v706_v10, %v85_v18  ;;  %v109_v27 = vadd.f32 %v706_v10, %v86_v19  ;;  %v116_v29 = vmax.f32 %v100_v22, 0.0  ;;  %v102_v49 = vadd.f32 %v706_v10, %v79_v35 }
   0xa   :  { %v117_v30 = vmax.f32 %v101_v23, 0.0  ;;  %v103_v50 = vadd.f32 %v706_v10, %v80_v36  ;;  %v89_v51 = vmul.f32 %v520_v43, %v695_v5  ;;  %v110_v52 = vadd.f32 %v706_v10, %v87_v38 }
   0xb   :  { %601 = vmatpush3.bf16.msra.mxu0 %v646_v2  ;;  %638 = vmatpush3.bf16.msra.mxu1 %v646_v2  ;;  %v124_v33 = vmax.f32 %v108_v26, 0.0  ;;  %v125_v34 = vmax.f32 %v109_v27, 0.0  ;;  %v111_v53 = vadd.f32 %v706_v10, %v88_v39  ;;  %v90_v54 = vmul.f32 %v521_v46, %v695_v5 }
   0xc   :  { %602 = vmatprep.subr.bf16.mxu0 %v647_v3  ;;  %631 = vmatprep.subr.bf16.mxu1 %v647_v3  ;;  %v132_v37 = vpack.c.bf16 %v117_v30, %v116_v29  ;;  %v508_v55 = vunpack.c.l.bf16 %v568_v44  ;;  %v104_v56 = vadd.f32 %v706_v10, %v81_v42  ;;  %v509_v57 = vunpack.c.h.bf16 %v568_v44 }
   0xd   :  { %v136_v41 = vpack.c.bf16 %v125_v34, %v124_v33  ;;  %v524_v58 = vunpack.c.l.bf16 %v572_v47  ;;  %v525_v59 = vunpack.c.h.bf16 %v572_v47  ;;  %v105_v60 = vadd.f32 %v706_v10, %v82_v45 }
   0xe   :  { %612 = vmatprep.mubr.bf16.mxu0 %v132_v37  ;;  %v112_v61 = vadd.f32 %v706_v10, %v89_v51  ;;  %v113_v62 = vadd.f32 %v706_v10, %v90_v54  ;;  %v118_v0 = vmax.f32 %v102_v49, 0.0  ;;  %v119_v1 = vmax.f32 %v103_v50, 0.0 }
   0xf   :  { %603 = vmatpush3.bf16.msra.mxu0 %v647_v3  ;;  %639 = vmatpush3.bf16.msra.mxu1 %v647_v3  ;;  %v126_v2 = vmax.f32 %v110_v52, 0.0  ;;  %v127_v3 = vmax.f32 %v111_v53, 0.0  ;;  %v83_v4 = vmul.f32 %v508_v55, %v695_v5  ;;  %v84_v6 = vmul.f32 %v509_v57, %v695_v5 }
  0x10   :  { %604 = vmatprep.subr.bf16.mxu0 %v648_v17  ;;  %632 = vmatprep.subr.bf16.mxu1 %v648_v17  ;;  %v91_v7 = vmul.f32 %v524_v58, %v695_v5  ;;  %v92_v8 = vmul.f32 %v525_v59, %v695_v5  ;;  %v120_v9 = vmax.f32 %v104_v56, 0.0  ;;  %v121_v11 = vmax.f32 %v105_v60, 0.0 }
  0x11   :  { %620 = vmatprep.mubr.bf16.mxu1 %v136_v41  ;;  %v128_v12 = vmax.f32 %v112_v61, 0.0  ;;  %v129_v13 = vmax.f32 %v113_v62, 0.0  ;;  %v133_v14 = vpack.c.bf16 %v119_v1, %v118_v0  ;;  %v137_v15 = vpack.c.bf16 %v127_v3, %v126_v2 }
  0x12   :  { %v106_v16 = vadd.f32 %v706_v10, %v83_v4  ;;  %v114_v18 = vadd.f32 %v706_v10, %v91_v7  ;;  %v115_v19 = vadd.f32 %v706_v10, %v92_v8  ;;  %v134_v5 = vpack.c.bf16 %v121_v11, %v120_v9 }
  0x13   :  { %605 = vmatpush3.bf16.msra.mxu0 %v648_v17  ;;  %640 = vmatpush3.bf16.msra.mxu1 %v648_v17  ;;  %v107_v17 = vadd.f32 %v706_v10, %v84_v6  ;;  %v138_v20 = vpack.c.bf16 %v129_v13, %v128_v12 }
  0x14   :  { %606 = vmatprep.subr.bf16.mxu0 %v649_v32  ;;  %633 = vmatprep.subr.bf16.mxu1 %v649_v32  ;;  %v122_v21 = vmax.f32 %v106_v16, 0.0  ;;  %v130_v23 = vmax.f32 %v114_v18, 0.0  ;;  %v131_v24 = vmax.f32 %v115_v19, 0.0 }
  0x15   :  { %v123_v22 = vmax.f32 %v107_v17, 0.0 }
  0x16   :  { %v139_v26 = vpack.c.bf16 %v131_v24, %v130_v23 }
  0x17   :  { %607 = vmatpush3.bf16.msra.mxu0 %v649_v32  ;;  %641 = vmatpush3.bf16.msra.mxu1 %v649_v32  ;;  %v135_v25 = vpack.c.bf16 %v123_v22, %v122_v21 }
  0x18   :  { %608 = vmatprep.subr.bf16.mxu0 %v650_v48  ;;  %634 = vmatprep.subr.bf16.mxu1 %v650_v48 }
  0x1b   :  { %609 = vmatpush3.bf16.msra.mxu0 %v650_v48  ;;  %642 = vmatpush3.bf16.msra.mxu1 %v650_v48 }
  0x1c   :  { %610 = vmatprep.subr.bf16.mxu0 %v651_v63  ;;  %635 = vmatprep.subr.bf16.mxu1 %v651_v63 }
  0x1f   :  { %611 = vmatpush3.bf16.msra.mxu0 %v651_v63  ;;  %643 = vmatpush3.bf16.msra.mxu1 %v651_v63 }
  0x22   :  { %613 = vmatmul.mubr.bf16.vlgmr.msra.gmra.mrb[0].mxu0 %v133_v14  ;;  %621 = vmatmul.mubr.bf16.vlgmr.msra.gmra.mrb[0].mxu1 %v137_v15 }
  0x23   :  { %616 = vmatprep.mubr.bf16.mxu0 %v134_v5  ;;  %624 = vmatprep.mubr.bf16.mxu1 %v138_v20 }
  0x2a   :  { %617 = vmatmul.mubr.bf16.gmra.mrb[4].mxu0 %v135_v25  ;;  %625 = vmatmul.mubr.bf16.gmra.mrb[4].mxu1 %v139_v26 }
  0xf5   :  { %v614_v27 = vpop.f32.mrb[0].mxu0  ;;  %v622_v28 = vpop.f32.mrb[0].mxu1 }
  0xf6   :  { %v254_v29 = vpop.f32.mrb[1].mxu0  ;;  %v286_v10 = vpop.f32.mrb[1].mxu1 }
  0xf7   :  { %v615_v30 = vpop.f32.mrb[2].mxu0  ;;  %v623_v31 = vpop.f32.mrb[2].mxu1 }
  0xf8   :  { %v534_v32 = vpack.c.bf16 %v615_v30, %v614_v27  ;;  %v554_v33 = vpack.c.bf16 %v623_v31, %v622_v28  ;;  %v257_v34 = vpop.f32.mrb[3].mxu0  ;;  %v289_v35 = vpop.f32.mrb[3].mxu1 }
  0xf9   :  { %v529_v36 = vpack.c.bf16 %v257_v34, %v254_v29  ;;  %v549_v37 = vpack.c.bf16 %v289_v35, %v286_v10 }
  0xfa   :  { %573 = vst [vmem:[%s795_s4 + $0x8] sm:$0xff] %v534_v32   ;;  %577 = vst [vmem:[%s795_s4 + $0x28] sm:$0xff] %v554_v33  }
  0xfb   :  { %530 = vst [vmem:[%s795_s4] sm:$0xff] %v529_v36   ;;  %576 = vst [vmem:[%s795_s4 + $0x20] sm:$0xff] %v549_v37  }
  0xfd   :  { %v618_v38 = vpop.f32.mrb[4].mxu0  ;;  %v626_v39 = vpop.f32.mrb[4].mxu1 }
  0xfe   :  { %v270_v40 = vpop.f32.mrb[5].mxu0  ;;  %v302_v41 = vpop.f32.mrb[5].mxu1 }
  0xff   :  { %v619_v42 = vpop.f32.mrb[6].mxu0  ;;  %v627_v43 = vpop.f32.mrb[6].mxu1 }
 0x100   :  { %v544_v44 = vpack.c.bf16 %v619_v42, %v618_v38  ;;  %v564_v45 = vpack.c.bf16 %v627_v43, %v626_v39  ;;  %v273_v46 = vpop.f32.mrb[7].mxu0  ;;  %v305_v47 = vpop.f32.mrb[7].mxu1 }
 0x101   :  { %v539_v48 = vpack.c.bf16 %v273_v46, %v270_v40  ;;  %v559_v49 = vpack.c.bf16 %v305_v47, %v302_v41 }
 0x102   :  { %575 = vst [vmem:[%s795_s4 + $0x18] sm:$0xff] %v544_v44   ;;  %579 = vst [vmem:[%s795_s4 + $0x38] sm:$0xff] %v564_v45  }
 0x103   :  { %574 = vst [vmem:[%s795_s4 + $0x10] sm:$0xff] %v539_v48   ;;  %578 = vst [vmem:[%s795_s4 + $0x30] sm:$0xff] %v559_v49  }

// kernel: encoder_forward.9
= control target key start
LH: loop header
LB: loop body
LE: loop exit
PB: predicated region body
PF: predicated region fallthrough
CT: control target
= control target key end

     0   :  { %s303_s0 = inlined_call_operand.vmem [shape: bf16[128,128], index: 0, kind: input, shape index: {}]   ;;  %s304_s1 = inlined_call_operand.vmem [shape: f32[1,128], index: 1, kind: input, shape index: {}]   ;;  %s305_s2 = inlined_call_operand.vmem [shape: f32[1,128], index: 2, kind: input, shape index: {}]   ;;  %s306_s3 = inlined_call_operand.vmem [shape: f32[128,128], index: 3, kind: output, shape index: {}]  }
   0x1   :  { %v131_v0 = vld [vmem:[%s303_s0] sm:$0xff]   ;;  %v162_v4 = vld [vmem:[%s303_s0 + $0x8] sm:$0xff]   ;;  %v163_v5 = vld [vmem:[%s303_s0 + $0x10] sm:$0xff]  }
   0x2   :  { %v195_v1 = vld [vmem:[%s304_s1] ss:$0 sm:$0xff]  ;;  %v132_v2 = vunpack.c.l.bf16 %v131_v0  ;;  %v133_v3 = vunpack.c.h.bf16 %v131_v0  ;;  %v164_v6 = vld [vmem:[%s303_s0 + $0x18] sm:$0xff]   ;;  %v136_v8 = vunpack.c.l.bf16 %v162_v4  ;;  %v137_v9 = vunpack.c.h.bf16 %v162_v4  ;;  %v166_v33 = vld [vmem:[%s303_s0 + $0x28] sm:$0xff]  }
   0x3   :  { %v209_v7 = vld [vmem:[%s305_s2] ss:$0 sm:$0xff]  ;;  %v140_v10 = vunpack.c.l.bf16 %v163_v5  ;;  %v141_v11 = vunpack.c.h.bf16 %v163_v5  ;;  %v144_v14 = vunpack.c.l.bf16 %v164_v6  ;;  %v145_v15 = vunpack.c.h.bf16 %v164_v6  ;;  %v167_v34 = vld [vmem:[%s303_s0 + $0x30] sm:$0xff]   ;;  %v168_v39 = vld [vmem:[%s303_s0 + $0x38] sm:$0xff]  }
   0x4   :  { %v53_v12 = vmul.f32 %v132_v2, %v195_v1  ;;  %v54_v13 = vmul.f32 %v133_v3, %v195_v1  ;;  %v55_v16 = vmul.f32 %v136_v8, %v195_v1  ;;  %v56_v17 = vmul.f32 %v137_v9, %v195_v1  ;;  %v165_v28 = vld [vmem:[%s303_s0 + $0x20] sm:$0xff]  }
   0x5   :  { %v57_v18 = vmul.f32 %v140_v10, %v195_v1  ;;  %v58_v19 = vmul.f32 %v141_v11, %v195_v1  ;;  %v59_v22 = vmul.f32 %v144_v14, %v195_v1  ;;  %v60_v23 = vmul.f32 %v145_v15, %v195_v1 }
   0x6   :  { %v76_v20 = vadd.f32 %v209_v7, %v53_v12  ;;  %v77_v21 = vadd.f32 %v209_v7, %v54_v13  ;;  %v78_v24 = vadd.f32 %v209_v7, %v55_v16  ;;  %v79_v25 = vadd.f32 %v209_v7, %v56_v17 }
   0x7   :  { %v80_v26 = vadd.f32 %v209_v7, %v57_v18  ;;  %v81_v27 = vadd.f32 %v209_v7, %v58_v19  ;;  %v82_v31 = vadd.f32 %v209_v7, %v59_v22  ;;  %v83_v32 = vadd.f32 %v209_v7, %v60_v23 }
   0x8   :  { %v92_v29 = vmax.f32 %v76_v20, 0.0  ;;  %v93_v30 = vmax.f32 %v77_v21, 0.0  ;;  %v94_v35 = vmax.f32 %v78_v24, 0.0  ;;  %v95_v36 = vmax.f32 %v79_v25, 0.0 }
   0x9   :  { %v96_v37 = vmax.f32 %v80_v26, 0.0  ;;  %v97_v38 = vmax.f32 %v81_v27, 0.0  ;;  %v98_v40 = vmax.f32 %v82_v31, 0.0  ;;  %v99_v41 = vmax.f32 %v83_v32, 0.0 }
   0xa   :  { %108 = vst [vmem:[%s306_s3] sm:$0xff] %v92_v29  ;;  %109 = vst [vmem:[%s306_s3 + $0x8] sm:$0xff] %v93_v30  ;;  %v148_v42 = vunpack.c.l.bf16 %v165_v28  ;;  %v149_v43 = vunpack.c.h.bf16 %v165_v28  ;;  %v152_v44 = vunpack.c.l.bf16 %v166_v33  ;;  %v153_v45 = vunpack.c.h.bf16 %v166_v33 }
   0xb   :  { %110 = vst [vmem:[%s306_s3 + $0x10] sm:$0xff] %v94_v35  ;;  %111 = vst [vmem:[%s306_s3 + $0x18] sm:$0xff] %v95_v36  ;;  %v156_v46 = vunpack.c.l.bf16 %v167_v34  ;;  %v157_v47 = vunpack.c.h.bf16 %v167_v34  ;;  %v160_v50 = vunpack.c.l.bf16 %v168_v39  ;;  %v161_v51 = vunpack.c.h.bf16 %v168_v39 }
   0xc   :  { %112 = vst [vmem:[%s306_s3 + $0x20] sm:$0xff] %v96_v37  ;;  %113 = vst [vmem:[%s306_s3 + $0x28] sm:$0xff] %v97_v38  ;;  %v61_v48 = vmul.f32 %v148_v42, %v195_v1  ;;  %v62_v49 = vmul.f32 %v149_v43, %v195_v1  ;;  %v63_v52 = vmul.f32 %v152_v44, %v195_v1 }
   0xd   :  { %114 = vst [vmem:[%s306_s3 + $0x30] sm:$0xff] %v98_v40  ;;  %115 = vst [vmem:[%s306_s3 + $0x38] sm:$0xff] %v99_v41  ;;  %v64_v53 = vmul.f32 %v153_v45, %v195_v1  ;;  %v65_v54 = vmul.f32 %v156_v46, %v195_v1  ;;  %v66_v55 = vmul.f32 %v157_v47, %v195_v1 }
   0xe   :  { %v84_v56 = vadd.f32 %v209_v7, %v61_v48  ;;  %v85_v57 = vadd.f32 %v209_v7, %v62_v49  ;;  %v67_v58 = vmul.f32 %v160_v50, %v195_v1  ;;  %v68_v59 = vmul.f32 %v161_v51, %v195_v1 }
   0xf   :  { %v86_v60 = vadd.f32 %v209_v7, %v63_v52  ;;  %v87_v61 = vadd.f32 %v209_v7, %v64_v53  ;;  %v88_v62 = vadd.f32 %v209_v7, %v65_v54  ;;  %v89_v63 = vadd.f32 %v209_v7, %v66_v55 }
  0x10   :  { %v100_v0 = vmax.f32 %v84_v56, 0.0  ;;  %v101_v2 = vmax.f32 %v85_v57, 0.0  ;;  %v90_v3 = vadd.f32 %v209_v7, %v67_v58  ;;  %v91_v4 = vadd.f32 %v209_v7, %v68_v59 }
  0x11   :  { %v102_v5 = vmax.f32 %v86_v60, 0.0  ;;  %v103_v6 = vmax.f32 %v87_v61, 0.0  ;;  %v104_v8 = vmax.f32 %v88_v62, 0.0  ;;  %v105_v9 = vmax.f32 %v89_v63, 0.0 }
  0x12   :  { %116 = vst [vmem:[%s306_s3 + $0x40] sm:$0xff] %v100_v0  ;;  %117 = vst [vmem:[%s306_s3 + $0x48] sm:$0xff] %v101_v2  ;;  %v106_v1 = vmax.f32 %v90_v3, 0.0  ;;  %v107_v10 = vmax.f32 %v91_v4, 0.0 }
  0x13   :  { %118 = vst [vmem:[%s306_s3 + $0x50] sm:$0xff] %v102_v5  ;;  %119 = vst [vmem:[%s306_s3 + $0x58] sm:$0xff] %v103_v6 }
  0x14   :  { %120 = vst [vmem:[%s306_s3 + $0x60] sm:$0xff] %v104_v8  ;;  %121 = vst [vmem:[%s306_s3 + $0x68] sm:$0xff] %v105_v9 }
  0x15   :  { %122 = vst [vmem:[%s306_s3 + $0x70] sm:$0xff] %v106_v1  ;;  %123 = vst [vmem:[%s306_s3 + $0x78] sm:$0xff] %v107_v10 }

</bundles_post_ra>
